<compile_context>
chip_gen: v7x
topology: tpu7x:2x2x1
jax: 0.10.0
libtpu: 0.0.40
codegen_flags: <defaults>
</compile_context>

<pallas_src>
import numpy as np
import jax
import jax.numpy as jnp
from jax.experimental import pallas as pl
from jax.experimental.pallas import tpu as pltpu

NUM_ELEMENTS = 93          # embedding vocabulary (atomic numbers 1..93)
VOCAB_PADDED = 128         # vocab rows padded to one lane width (aligned MXU K=128)
ATOM_TILE = 512            # atoms per grid step (multiple of 8)
MAX_COL_TILE = 1024        # max embedding columns per grid step (multiple of 128)


def _round_up(a, m):
    return ((a + m - 1) // m) * m


def _atom_embedding_kernel(z_ref, table_ref, out_ref):
    # z_ref:     (tile, 1)          int32   atomic numbers (1-based)
    # table_ref: (128, col_tile)    float32 padded embedding-table column block
    # out_ref:   (tile, col_tile)   float32 (or bf16)
    idx = z_ref[...] - 1                                     # PyTorch does Z - 1
    tile = out_ref.shape[0]
    vocab = table_ref.shape[0]                               # 128 (padded)
    lane_ids = jax.lax.broadcasted_iota(jnp.int32, (tile, vocab), 1)
    one_hot = (lane_ids == idx).astype(table_ref.dtype)      # (tile, 128) f32
    # Exact gather: exactly one 1.0 per valid row, f32 accumulate on the MXU.
    out_ref[...] = jnp.dot(
        one_hot, table_ref[...], preferred_element_type=jnp.float32
    ).astype(out_ref.dtype)


def pad_table(table):
    """Pad a (93, emb_size) table to (128, emb_size) with zero rows.

    Hoist this out of the forward path: call once at init and reuse the result.
    The padded rows can never match an index in [0, 92], so results are
    unchanged.  Columns are NOT padded (keeps output writeback lane-exact).
    """
    vocab = table.shape[0]
    return jnp.pad(table.astype(jnp.float32), ((0, VOCAB_PADDED - vocab), (0, 0)))


def atom_embedding(Z, table, out_dtype=jnp.float32):
    """Z: int (nAtoms,), values in [1, 93]; table: (93 or 128, emb_size) f32."""
    n_atoms = Z.shape[0]
    if table.shape[0] != VOCAB_PADDED:
        # Fallback for un-prepared tables; prefer calling pad_table() once at init.
        table = pad_table(table)
    emb_size = table.shape[1]

    z2d = Z.astype(jnp.int32).reshape(n_atoms, 1)            # metadata-only reshape

    # Atom tile: big for throughput, shrinks to a single (possibly ragged) block
    # for tiny inputs.  Column tile: full emb_size unless very large, in which
    # case block columns so 2*(tile*col_tile*4B) output buffers stay well under
    # the scoped VMEM limit on every generation (v5e 16 MiB is the tightest).
    tile = min(ATOM_TILE, _round_up(n_atoms, 8))
    col_tile = emb_size if emb_size <= MAX_COL_TILE else MAX_COL_TILE
    grid = (pl.cdiv(emb_size, col_tile), pl.cdiv(n_atoms, tile))  # (cols outer, atoms inner)

    return pl.pallas_call(
        _atom_embedding_kernel,
        out_shape=jax.ShapeDtypeStruct((n_atoms, emb_size), out_dtype),
        grid_spec=pltpu.PrefetchScalarGridSpec(
            num_scalar_prefetch=0,
            grid=grid,
            in_specs=[
                pl.BlockSpec((tile, 1), lambda j, i: (i, 0)),                  # Z rows
                pl.BlockSpec((VOCAB_PADDED, col_tile), lambda j, i: (0, j)),   # table cols
            ],
            out_specs=pl.BlockSpec((tile, col_tile), lambda j, i: (i, j)),
        ),
        compiler_params=pltpu.CompilerParams(
            # Atom axis shards across v7x's two TensorCores; swap to
            # pltpu.CORE_PARALLEL if a v7x profile shows no cross-core split.
            dimension_semantics=("parallel", "parallel"),
        ),
    )(z2d, table)


def init_embedding_table(key, emb_size):
    # torch.nn.init.uniform_(weight, a=-sqrt(3), b=sqrt(3))
    lim = np.sqrt(3.0)
    return jax.random.uniform(
        key, (NUM_ELEMENTS, emb_size), dtype=jnp.float32, minval=-lim, maxval=lim
    )


def reference(Z, table):
    return table[Z.astype(jnp.int32) - 1]


def _check(h, Z, table, n_atoms, emb_size):
    np.testing.assert_allclose(np.asarray(h), np.asarray(reference(Z, table)),
                               rtol=1e-6, atol=1e-6)
    assert h.shape == (n_atoms, emb_size)
    assert h.dtype == jnp.float32


if __name__ == "__main__":
    key = jax.random.PRNGKey(0)
    k_t1, k_z1, k_t2, k_z2, k_t3, k_z3 = jax.random.split(key, 6)

    # Case 1: the module's canonical small case (8 atoms, emb_size=32).
    # emb_size < 128 -> unpadded output columns (masked vst, no extra traffic).
    emb_size, n_atoms = 32, 8
    table = init_embedding_table(k_t1, emb_size)
    table_p = pad_table(table)                       # pad once, outside the call
    Z = jax.random.randint(k_z1, (n_atoms,), minval=1, maxval=NUM_ELEMENTS + 1,
                           dtype=jnp.int32)
    h = jax.block_until_ready(atom_embedding(Z, table_p))
    _check(h, Z, table, n_atoms, emb_size)

    # Case 2: nAtoms not a multiple of 8/tile, emb_size == 128 (lane-dense
    # output, ragged last row block handled by Pallas writeback masking).
    emb_size2, n_atoms2 = 128, 300
    table2 = init_embedding_table(k_t2, emb_size2)
    table2_p = pad_table(table2)
    Z2 = jax.random.randint(k_z2, (n_atoms2,), minval=1, maxval=NUM_ELEMENTS + 1,
                            dtype=jnp.int32)
    h2 = jax.block_until_ready(atom_embedding(Z2, table2_p))
    _check(h2, Z2, table2, n_atoms2, emb_size2)

    # Case 3: large embedding (emb_size > MAX_COL_TILE) + multiple atom blocks:
    # exercises the column-blocked grid and ragged last blocks on both axes.
    emb_size3, n_atoms3 = 1536, 1000
    table3 = init_embedding_table(k_t3, emb_size3)
    table3_p = pad_table(table3)
    Z3 = jax.random.randint(k_z3, (n_atoms3,), minval=1, maxval=NUM_ELEMENTS + 1,
                            dtype=jnp.int32)
    h3 = jax.block_until_ready(atom_embedding(Z3, table3_p))
    _check(h3, Z3, table3, n_atoms3, emb_size3)

    print("KERNEL_OK")
</pallas_src>

<mosaic_0001>
module attributes {stable_mosaic.version = 11 : i64} {
  func.func @_atom_embedding_kernel(%arg0: i32, %arg1: i32, %arg2: memref<8x1xi32, #tpu.memory_space<vmem>>, %arg3: memref<128x32xf32, #tpu.memory_space<vmem>>, %arg4: memref<8x32xf32, #tpu.memory_space<vmem>>) attributes {dimension_semantics = [#tpu.dimension_semantics<parallel>, #tpu.dimension_semantics<parallel>], iteration_bounds = array<i64: 1, 1>, scalar_prefetch = 0 : i64, scratch_operands = 0 : i64, tpu.core_type = #tpu.core_type<tc>, window_params = [{transform_indices = @transform_0, window_bounds = array<i64: 8, 1>}, {transform_indices = @transform_1, window_bounds = array<i64: 128, 32>}, {transform_indices = @transform_2, window_bounds = array<i64: 8, 32>}]} {
    %c0 = arith.constant 0 : index
    %c0_0 = arith.constant 0 : index
    %0 = vector.load %arg2[%c0, %c0_0] : memref<8x1xi32, #tpu.memory_space<vmem>>, vector<8x1xi32>
    %c1_i32 = arith.constant 1 : i32
    %1 = vector.broadcast %c1_i32 : i32 to vector<8x1xi32>
    %2 = arith.subi %0, %1 : vector<8x1xi32>
    %3 = tpu.iota {dimensions = array<i32: 1>} : vector<8x128xi32>
    %4 = vector.broadcast %2 : vector<8x1xi32> to vector<8x128xi32>
    %5 = arith.cmpi eq, %3, %4 : vector<8x128xi32>
    %6 = arith.extui %5 : vector<8x128xi1> to vector<8x128xi32>
    %7 = arith.sitofp %6 : vector<8x128xi32> to vector<8x128xf32>
    %c0_1 = arith.constant 0 : index
    %c0_2 = arith.constant 0 : index
    %8 = vector.load %arg3[%c0_1, %c0_2] : memref<128x32xf32, #tpu.memory_space<vmem>>, vector<128x32xf32>
    %cst = arith.constant dense<0.000000e+00> : vector<8x32xf32>
    %9 = tpu.matmul %7, %8, %cst {dimension_numbers = #tpu.dot_dimension_numbers<[1], [0], [0], [1], [0, 0, 1, 1], [], []>} : vector<8x128xf32>, vector<128x32xf32>, vector<8x32xf32> -> vector<8x32xf32>
    %c0_3 = arith.constant 0 : index
    %c0_4 = arith.constant 0 : index
    %10 = vector.load %arg4[%c0_3, %c0_4] : memref<8x32xf32, #tpu.memory_space<vmem>>, vector<8x32xf32>
    tpu.vector_store %arg4[%c0_3, %c0_4], %9 {strides = array<i32>} : memref<8x32xf32, #tpu.memory_space<vmem>>, vector<8x32xf32>,
    return
  }
  func.func @transform_0(%arg0: i32, %arg1: i32) -> (i32, i32) {
    %c0_i32 = arith.constant 0 : i32
    %c0_i32_0 = arith.constant 0 : i32
    return %arg1, %c0_i32 : i32, i32
  }
  func.func @transform_1(%arg0: i32, %arg1: i32) -> (i32, i32) {
    %c0_i32 = arith.constant 0 : i32
    %c0_i32_0 = arith.constant 0 : i32
    return %c0_i32, %arg0 : i32, i32
  }
  func.func @transform_2(%arg0: i32, %arg1: i32) -> (i32, i32) {
    %c0_i32 = arith.constant 0 : i32
    return %arg1, %arg0 : i32, i32
  }
}

</mosaic_0001>

<bundles_post_ra>
// kernel: tpu_custom_call.1
= control target key start
LH: loop header
LB: loop body
LE: loop exit
PB: predicated region body
PF: predicated region fallthrough
CT: control target
= control target key end

     0   :  { %v234_v3 = vmov 0   ;;  %v235_v5 = vmov 0.0|0.0   ;;  %vm236_vm0 = vmmov 0   ;;  %v237_v12 = vmov 0.0   ;;  %s318_s0 = inlined_call_operand.vmem [shape: s32[8,1], index: 0, kind: input, shape index: {}]   ;;  %s319_s1 = inlined_call_operand.vmem [shape: f32[128,32], index: 1, kind: input, shape index: {}]   ;;  %s320_s2 = inlined_call_operand.hbm [shape: f32[8,32], index: 2, kind: output, shape index: {}]  }
   0x1   :  { %v12_v0 = vld [vmem:[%s318_s0] sm:$0xff]  ;;  %v23_v2 = vld [vmem:[%s319_s1 + $0x8] sm:$0xff]  ;;  %209 = vset.pattern.permute.xlu0 %v234_v3  ;;  %179 = vmatprep.subr.bf16.mxu0 %v235_v5  ;;  %v24_v7 = vld [vmem:[%s319_s1 + $0x10] sm:$0xff] }
   0x2   :  { %v22_v1 = vld [vmem:[%s319_s1] sm:$0xff]  ;;  %v124_v4 = vadd.s32 4294967295, %v12_v0  ;;  %v25_v8 = vld [vmem:[%s319_s1 + $0x18] sm:$0xff]  ;;  %v27_v11 = vld [vmem:[%s319_s1 + $0x28] sm:$0xff]  ;;  %176 = vmatprep.mubr.msk.f32.mxu0 %vm236_vm0, %v237_v12 }
   0x3   :  { %v180_v6 = vpack.c.bf16 %v23_v2, %v22_v1  ;;  %v183_v9 = vpack.c.bf16 %v25_v8, %v24_v7  ;;  %v26_v10 = vld [vmem:[%s319_s1 + $0x20] sm:$0xff] }
   0x4   :  { %17 = vperm.xlu0 %209, %v124_v4  }
   0x5   :  { %181 = vmatpush3.bf16.msra.mxu0 %v180_v6 }
   0x6   :  { %182 = vmatprep.subr.bf16.mxu0 %v235_v5 }
   0x7   :  { %7 = vsyncpa [#allocation3], 0  ;;  %v186_v13 = vpack.c.bf16 %v27_v11, %v26_v10  ;;  %v28_v14 = vld [vmem:[%s319_s1 + $0x30] sm:$0xff]  ;;  %v29_v15 = vld [vmem:[%s319_s1 + $0x38] sm:$0xff]  ;;  %v14_v29 = vlaneseq  ;;  %v238_v32 = vmov 1.0   ;;  %s239_s14 = smov [#allocation2]  }
   0x8   :  { %v189_v16 = vpack.c.bf16 %v29_v15, %v28_v14  ;;  %v30_v17 = vld [vmem:[%s319_s1 + $0x40] sm:$0xff]  ;;  %v31_v18 = vld [vmem:[%s319_s1 + $0x48] sm:$0xff]  ;;  %v32_v20 = vld [vmem:[%s319_s1 + $0x50] sm:$0xff]  ;;  %s116_s15 = sshll.u32 %s239_s14, 4  ;;  %vm108_vm2 = vcmask 261120   ;;  %s117_s15 = int_to_ptr.vmem [resolvable:$true] %s116_s15 }
   0x9   :  { %184 = vmatpush3.bf16.msra.mxu0 %v183_v9  ;;  %v192_v19 = vpack.c.bf16 %v31_v18, %v30_v17  ;;  %v33_v21 = vld [vmem:[%s319_s1 + $0x58] sm:$0xff]  ;;  %v34_v23 = vld [vmem:[%s319_s1 + $0x60] sm:$0xff]  ;;  %v35_v24 = vld [vmem:[%s319_s1 + $0x68] sm:$0xff]  ;;  %v15_v30 = vand.u32 127, %v14_v29  ;;  %s210_s16 = scalar_lea.vmem %s117_s15, 128  ;;  %p215_p1 = scmp.lt.s32.totalorder %s117_s15, %s117_s15 }
   0xa   :  { %185 = vmatprep.subr.bf16.mxu0 %v235_v5  ;;  %v195_v22 = vpack.c.bf16 %v33_v21, %v32_v20  ;;  %v198_v25 = vpack.c.bf16 %v35_v24, %v34_v23  ;;  %v36_v26 = vld [vmem:[%s319_s1 + $0x70] sm:$0xff]  ;;  %v37_v27 = vld [vmem:[%s319_s1 + $0x78] sm:$0xff]  ;;  %p211_p0 = scmp.ne.s32.totalorder %s117_s15, %s210_s16  ;;  %p216_p2 = scmp.lt.s32.totalorder %s210_s16, %s210_s16 }
   0xb   :  { %v201_v28 = vpack.c.bf16 %v37_v27, %v36_v26 }
   0xc   :  { %p217_p3 = por %p216_p2, %p215_p1 }
   0xd   :  { %187 = vmatpush3.bf16.msra.mxu0 %v186_v13 }
   0xe   :  { %188 = vmatprep.subr.bf16.mxu0 %v235_v5  ;;  %p218_p4 = pnand %p217_p3, %p211_p0 }
  0x11   :  { %190 = vmatpush3.bf16.msra.mxu0 %v189_v16 }
  0x12   :  { %191 = vmatprep.subr.bf16.mxu0 %v235_v5 }
  0x15   :  { %193 = vmatpush3.bf16.msra.mxu0 %v192_v19 }
  0x16   :  { %194 = vmatprep.subr.bf16.mxu0 %v235_v5 }
  0x19   :  { %196 = vmatpush3.bf16.msra.mxu0 %v195_v22 }
  0x1a   :  { %197 = vmatprep.subr.bf16.mxu0 %v235_v5 }
  0x1d   :  { %199 = vmatpush3.bf16.msra.mxu0 %v198_v25 }
  0x1e   :  { %200 = vmatprep.subr.bf16.mxu0 %v235_v5 }
  0x21   :  { %202 = vmatpush3.bf16.msra.mxu0 %v201_v28 }
  0x83   :  { %v18_v31 = vpop.permute.xlu0 %17 }
  0x84   :  { %vm19_vm1 = vcmp.eq.s32.totalorder %v15_v30, %v18_v31 }
  0x85   :  { %177 = vmatmul.mubr.msk.f32.vlgmr.msra.gmra.mrb[0].mxu0 %vm19_vm1, %v238_v32 }
 0x158   :  { %v104_v33 = vpop.f32.mrb[0].mxu0 }
 0x159   :  { %109 = vst.msk [vmem:[#allocation2] sm:$0xff] %vm108_vm2, %v104_v33  ;;  %v178_v34 = vpop.f32.mrb[1].mxu0 }
 0x15a   :  { %221 = shalt.err (!%p218_p4)
}
 0x15b   :  { %s222_s0 = scalar_lea.hbm %s320_s2, 128 }
 0x15c   :  { %p223_p5 = scmp.ne.s32.totalorder %s320_s2, %s222_s0  ;;  %p226_p6 = scmp.lt.u32.totalorder %s222_s0, %s320_s2 }
 0x15e   :  { %p228_p7 = pnand %p226_p6, %p223_p5 }
 0x160   :  { %231 = shalt.err (!%p228_p7)
}
 0x161   :  { %119 = dma.vmem_to_hbm [thread:$0]  %s117_s15, 128, %s320_s2, [#allocation3]  }
 0x162   :  { %232 = dma.done.wait [#allocation3], 128  }
 0x163   :  { %233 = vsyncadd [#allocation3], 4294967168 }
 0x164   :  { %123 = vsyncpa [#allocation3], 1 }

</bundles_post_ra>
